<compile_context>
chip_gen: v7x
topology: tpu7x:2x2x1
jax: 0.10.0
libtpu: 0.0.40
codegen_flags: <defaults>
</compile_context>

<pallas_src>
import functools

import jax
import jax.numpy as jnp
from jax.experimental import pallas as pl
from jax.experimental.pallas import tpu as pltpu

BN_EPS = 1e-5


# --------------------------------------------------------------------------
# small in-kernel helpers
# --------------------------------------------------------------------------
def _group_maps(num_cols, num_ch):
    """One-hot channel<->column maps for columns laid out (..., channel)."""
    col = jax.lax.broadcasted_iota(jnp.int32, (num_ch, num_cols), 1)
    ch = jax.lax.broadcasted_iota(jnp.int32, (num_ch, num_cols), 0)
    bcast = (col % num_ch == ch).astype(jnp.float32)          # [ch, cols]
    col_t = jax.lax.broadcasted_iota(jnp.int32, (num_cols, num_ch), 0)
    ch_t = jax.lax.broadcasted_iota(jnp.int32, (num_cols, num_ch), 1)
    reduce = (col_t % num_ch == ch_t).astype(jnp.float32)      # [cols, ch]
    return bcast, reduce


def _bn_fold(colsum, colsq, gamma, beta, count, bcast=None, reduce=None):
    """Training-mode BatchNorm folded into per-column scale/shift (f32)."""
    if reduce is not None:   # aggregate column sums into per-channel sums
        colsum = jnp.dot(colsum, reduce, preferred_element_type=jnp.float32)
        colsq = jnp.dot(colsq, reduce, preferred_element_type=jnp.float32)
    mean = colsum / count
    var = colsq / count - mean * mean          # biased variance (PyTorch train)
    scale = gamma * jax.lax.rsqrt(var + BN_EPS)
    shift = beta - mean * scale
    if bcast is not None:    # broadcast per-channel scale/shift back to columns
        scale = jnp.dot(scale, bcast, preferred_element_type=jnp.float32)
        shift = jnp.dot(shift, bcast, preferred_element_type=jnp.float32)
    return scale, shift


# --------------------------------------------------------------------------
# fused kernel: conv1..conv1x1_2 (+ BN1..BN4 + ReLU) in one pallas_call
# --------------------------------------------------------------------------
def _fused_cnn4_kernel(x_ref, w1_ref, w2_ref, w3_ref, w4_ref, bn_ref, o_ref,
                       y1_ref, sum_ref, sq_ref, *, n_valid, tile_rows):
    i = pl.program_id(0)

    @pl.when(i == 0)
    def _init():
        sum_ref[...] = jnp.zeros_like(sum_ref)
        sq_ref[...] = jnp.zeros_like(sq_ref)
        o_ref[...] = jnp.zeros_like(o_ref)

    # ---- stage 1: conv1 as a block-diagonal im2col matmul, streamed ------
    y1 = jnp.dot(x_ref[...], w1_ref[...], preferred_element_type=jnp.float32)
    row0 = pl.multiple_of(i * tile_rows, tile_rows)
    y1_ref[pl.ds(row0, tile_rows), :] = y1
    # cross-tile accumulators for exact batch BN1 statistics
    sum_ref[...] += jnp.sum(y1, axis=0, keepdims=True)
    sq_ref[...] += jnp.sum(y1 * y1, axis=0, keepdims=True)

    # ---- last tile: BN1 + the remaining (tiny) stages, all in VMEM -------
    @pl.when(i == pl.num_programs(0) - 1)
    def _tail():
        p_pad = y1_ref.shape[0]
        needs_mask = p_pad != n_valid
        if needs_mask:
            rmask = jax.lax.broadcasted_iota(jnp.int32, (p_pad, 1), 0) < n_valid

        g1b, g1r = _group_maps(64, 4)    # conv1 cols ordered (pos, ch): ch = col % 4
        g2b, g2r = _group_maps(32, 8)    # conv2 cols ordered (pos, ch): ch = col % 8

        gamma1, beta1 = bn_ref[0:1, 0:4], bn_ref[1:2, 0:4]
        gamma2, beta2 = bn_ref[2:3, 0:8], bn_ref[3:4, 0:8]
        gamma3, beta3 = bn_ref[4:5, 0:16], bn_ref[5:6, 0:16]
        gamma4, beta4 = bn_ref[6:7, 0:4], bn_ref[7:8, 0:4]
        w5, b5 = bn_ref[8:9, 0:4], bn_ref[8:9, 4:5]

        # BN1 (stats accumulated across row tiles) + ReLU
        s1, t1 = _bn_fold(sum_ref[...], sq_ref[...], gamma1, beta1,
                          float(n_valid) * 16.0, g1b, g1r)
        a1 = jnp.maximum(y1_ref[...] * s1 + t1, 0.0)
        if needs_mask:
            a1 = jnp.where(rmask, a1, 0.0)

        # conv2 + BN2 + ReLU
        y2 = jnp.dot(a1.astype(jnp.bfloat16), w2_ref[...],
                     preferred_element_type=jnp.float32)
        s2, t2 = _bn_fold(jnp.sum(y2, axis=0, keepdims=True),
                          jnp.sum(y2 * y2, axis=0, keepdims=True),
                          gamma2, beta2, float(n_valid) * 4.0, g2b, g2r)
        a2 = jnp.maximum(y2 * s2 + t2, 0.0)
        if needs_mask:
            a2 = jnp.where(rmask, a2, 0.0)

        # conv3 + BN3 + ReLU   (columns == channels from here on)
        y3 = jnp.dot(a2.astype(jnp.bfloat16), w3_ref[...],
                     preferred_element_type=jnp.float32)
        s3, t3 = _bn_fold(jnp.sum(y3, axis=0, keepdims=True),
                          jnp.sum(y3 * y3, axis=0, keepdims=True),
                          gamma3, beta3, float(n_valid))
        a3 = jnp.maximum(y3 * s3 + t3, 0.0)
        if needs_mask:
            a3 = jnp.where(rmask, a3, 0.0)

        # conv1x1_1 + BN + ReLU
        y4 = jnp.dot(a3.astype(jnp.bfloat16), w4_ref[...],
                     preferred_element_type=jnp.float32)
        s4, t4 = _bn_fold(jnp.sum(y4, axis=0, keepdims=True),
                          jnp.sum(y4 * y4, axis=0, keepdims=True),
                          gamma4, beta4, float(n_valid))
        a4 = jnp.maximum(y4 * s4 + t4, 0.0)

        # conv1x1_2 (bias kept; no BN / ReLU)
        o_ref[...] = jnp.sum(a4 * w5, axis=1, keepdims=True) + b5


# --------------------------------------------------------------------------
# JAX-side glue: hierarchical patchify, weight packing, expand
# --------------------------------------------------------------------------
def _round_up(x, m):
    return ((x + m - 1) // m) * m


def _patchify_hier(x, g):
    """NCHW -> [N*g*g, 256*C] rows, one row per 16x16 patch.

    Feature order is (r2, c2, a1, b1, c_in, kh, kw) so that conv1 / conv2
    become block-diagonal matmuls and no in-kernel reshapes are needed.
    """
    n, c, _, _ = x.shape
    x = x.reshape(n, c, g, 2, 2, 4, g, 2, 2, 4)
    #            n  c  i  r2 a1 kh j  c2 b1 kw
    x = x.transpose(0, 2, 6, 3, 7, 4, 8, 1, 5, 9)
    return x.reshape(n * g * g, 16 * c * 16)


def _prepare_weights(params):
    # Biases of conv1..conv1x1_1 are exactly cancelled by the batch-mean
    # subtraction of training-mode BatchNorm, so they are not passed in.
    w1, _b1, ga1, be1 = params["conv1"]
    w2, _b2, ga2, be2 = params["conv2"]
    w3, _b3, ga3, be3 = params["conv3"]
    w4, _b4, ga4, be4 = params["conv1x1_1"]
    w5, b5 = params["conv1x1_2"]

    w1_mat = w1.reshape(4, 48).T                                  # (c,kh,kw) x c_out
    w1_big = jnp.kron(jnp.eye(16, dtype=jnp.float32), w1_mat)     # [768, 64] block-diag
    w2_blk = w2.transpose(2, 3, 1, 0).reshape(16, 8)              # (kh,kw,c) x c_out
    w2_big = jnp.kron(jnp.eye(4, dtype=jnp.float32), w2_blk)      # [64, 32] block-diag
    w3_mat = w3.transpose(2, 3, 1, 0).reshape(32, 16)             # [32, 16]
    w4_mat = w4.reshape(4, 16).T                                  # [16, 4]

    def pad16(v):
        return jnp.pad(v, (0, 16 - v.shape[0]))

    bn_pack = jnp.stack([
        pad16(ga1), pad16(be1), pad16(ga2), pad16(be2),
        pad16(ga3), pad16(be3), pad16(ga4), pad16(be4),
        pad16(jnp.concatenate([w5.reshape(4), b5.reshape(1)])),
    ]).astype(jnp.float32)                                        # [9, 16]

    return (w1_big.astype(jnp.bfloat16), w2_big.astype(jnp.bfloat16),
            w3_mat.astype(jnp.bfloat16), w4_mat.astype(jnp.bfloat16), bn_pack)


def build_cnn4_forward(params, inputs):
    n, c, wdt, _ = inputs.shape
    assert c == 3 and wdt % 16 == 0
    g = wdt // 16
    p = n * g * g                       # number of 16x16 patches (= final pixels)
    kdim = 256 * c                      # 768 conv1 im2col features per patch

    tile_rows = 512 if p >= 512 else _round_up(p, 8)
    p_pad = _round_up(p, tile_rows)
    n_tiles = p_pad // tile_rows

    x_rows = _patchify_hier(inputs, g).astype(jnp.bfloat16)
    if p_pad > p:
        x_rows = jnp.pad(x_rows, ((0, p_pad - p), (0, 0)))

    w1_big, w2_big, w3_mat, w4_mat, bn_pack = _prepare_weights(params)

    kernel = functools.partial(_fused_cnn4_kernel, n_valid=p, tile_rows=tile_rows)
    out = pl.pallas_call(
        kernel,
        out_shape=jax.ShapeDtypeStruct((p_pad, 1), jnp.float32),
        grid_spec=pltpu.PrefetchScalarGridSpec(
            num_scalar_prefetch=0,
            grid=(n_tiles,),
            in_specs=[
                pl.BlockSpec((tile_rows, kdim), lambda i: (i, 0)),   # streamed im2col
                pl.BlockSpec((kdim, 64), lambda i: (0, 0)),          # conv1 (block-diag)
                pl.BlockSpec((64, 32), lambda i: (0, 0)),            # conv2 (block-diag)
                pl.BlockSpec((32, 16), lambda i: (0, 0)),            # conv3
                pl.BlockSpec((16, 4), lambda i: (0, 0)),             # conv1x1_1
                pl.BlockSpec((9, 16), lambda i: (0, 0)),             # packed BN / w5 / b5
            ],
            out_specs=pl.BlockSpec((p_pad, 1), lambda i: (0, 0)),
            scratch_shapes=[
                pltpu.VMEM((p_pad, 64), jnp.float32),    # resident conv1 output
                pltpu.VMEM((1, 64), jnp.float32),        # BN1 column sums
                pltpu.VMEM((1, 64), jnp.float32),        # BN1 column sum-of-squares
            ],
        ),
        compiler_params=pltpu.CompilerParams(
            dimension_semantics=("arbitrary",),   # batch-wide BN reduction couples tiles
            vmem_limit_bytes=48 * 1024 * 1024,
        ),
    )(x_rows, w1_big, w2_big, w3_mat, w4_mat, bn_pack)

    # 16x block-expand of the [N,1,W/16,W/16] mask to [N,1,W,W] (single XLA broadcast).
    z = out[:p, 0].reshape(n, 1, g, g)
    return jnp.broadcast_to(z[:, :, :, None, :, None],
                            (n, 1, g, 16, g, 16)).reshape(n, 1, wdt, wdt)


# --------------------------------------------------------------------------
# parameters (fresh-module style: BN gamma=1, beta=0; training-mode stats)
# --------------------------------------------------------------------------
def init_params(key):
    def nrm(k, shape, scale=0.1):
        return scale * jax.random.normal(k, shape, dtype=jnp.float32)

    ks = jax.random.split(key, 10)
    return {
        # (conv weight [Co,Ci,kh,kw], conv bias [Co], bn gamma [Co], bn beta [Co])
        "conv1": (nrm(ks[0], (4, 3, 4, 4)), nrm(ks[1], (4,)),
                  jnp.ones((4,), jnp.float32), jnp.zeros((4,), jnp.float32)),
        "conv2": (nrm(ks[2], (8, 4, 2, 2)), nrm(ks[3], (8,)),
                  jnp.ones((8,), jnp.float32), jnp.zeros((8,), jnp.float32)),
        "conv3": (nrm(ks[4], (16, 8, 2, 2)), nrm(ks[5], (16,)),
                  jnp.ones((16,), jnp.float32), jnp.zeros((16,), jnp.float32)),
        "conv1x1_1": (nrm(ks[6], (4, 16, 1, 1)), nrm(ks[7], (4,)),
                      jnp.ones((4,), jnp.float32), jnp.zeros((4,), jnp.float32)),
        "conv1x1_2": (nrm(ks[8], (1, 4, 1, 1)), nrm(ks[9], (1,))),
    }


# --------------------------------------------------------------------------
if __name__ == "__main__":
    key = jax.random.PRNGKey(0)
    pkey, xkey = jax.random.split(key)
    params = init_params(pkey)

    # NCHW, 3 channels, spatial 32 (32 -> /4 -> 8 -> /2 -> 4 -> /2 -> 2 -> x16 -> 32)
    x = jax.random.normal(xkey, (2, 3, 32, 32), dtype=jnp.float32)

    fwd = jax.jit(build_cnn4_forward)
    out = jax.block_until_ready(fwd(params, x))
    assert out.shape == (2, 1, 32, 32), out.shape
    assert bool(jnp.all(jnp.isfinite(out)))
    print("KERNEL_OK")
</pallas_src>

<mosaic_0001>
module attributes {stable_mosaic.version = 11 : i64} {
  func.func @_fused_cnn4_kernel(%arg0: i32, %arg1: memref<8x768xbf16, #tpu.memory_space<vmem>>, %arg2: memref<768x64xbf16, #tpu.memory_space<vmem>>, %arg3: memref<64x32xbf16, #tpu.memory_space<vmem>>, %arg4: memref<32x16xbf16, #tpu.memory_space<vmem>>, %arg5: memref<16x4xbf16, #tpu.memory_space<vmem>>, %arg6: memref<9x16xf32, #tpu.memory_space<vmem>>, %arg7: memref<8x1xf32, #tpu.memory_space<vmem>>, %arg8: memref<8x64xf32, #tpu.memory_space<vmem>>, %arg9: memref<1x64xf32, #tpu.memory_space<vmem>>, %arg10: memref<1x64xf32, #tpu.memory_space<vmem>>) attributes {dimension_semantics = [#tpu.dimension_semantics<arbitrary>], iteration_bounds = array<i64: 1>, scalar_prefetch = 0 : i64, scratch_operands = 3 : i64, tpu.core_type = #tpu.core_type<tc>, window_params = [{transform_indices = @transform_0, window_bounds = array<i64: 8, 768>}, {pipeline_mode = #tpu.pipeline_mode<synchronous>, transform_indices = @transform_1, window_bounds = array<i64: 768, 64>}, {pipeline_mode = #tpu.pipeline_mode<synchronous>, transform_indices = @transform_2, window_bounds = array<i64: 64, 32>}, {pipeline_mode = #tpu.pipeline_mode<synchronous>, transform_indices = @transform_3, window_bounds = array<i64: 32, 16>}, {pipeline_mode = #tpu.pipeline_mode<synchronous>, transform_indices = @transform_4, window_bounds = array<i64: 16, 4>}, {pipeline_mode = #tpu.pipeline_mode<synchronous>, transform_indices = @transform_5, window_bounds = array<i64: 9, 16>}, {pipeline_mode = #tpu.pipeline_mode<synchronous>, transform_indices = @transform_6, window_bounds = array<i64: 8, 1>}]} {
    %c0_i32 = arith.constant 0 : i32
    %0 = arith.cmpi eq, %arg0, %c0_i32 : i32
    %1 = arith.extui %0 : i1 to i32
    %c0_i32_0 = arith.constant 0 : i32
    %2 = arith.cmpi ne, %1, %c0_i32_0 : i32
    scf.if %2 {
      %cst_17 = arith.constant 0.000000e+00 : f32
      %24 = vector.broadcast %cst_17 : f32 to vector<1x64xf32>
      %c0_18 = arith.constant 0 : index
      %c0_19 = arith.constant 0 : index
      %25 = vector.load %arg9[%c0_18, %c0_19] : memref<1x64xf32, #tpu.memory_space<vmem>>, vector<1x64xf32>
      tpu.vector_store %arg9[%c0_18, %c0_19], %24 {strides = array<i32>} : memref<1x64xf32, #tpu.memory_space<vmem>>, vector<1x64xf32>,
      %cst_20 = arith.constant 0.000000e+00 : f32
      %26 = vector.broadcast %cst_20 : f32 to vector<1x64xf32>
      %c0_21 = arith.constant 0 : index
      %c0_22 = arith.constant 0 : index
      %27 = vector.load %arg10[%c0_21, %c0_22] : memref<1x64xf32, #tpu.memory_space<vmem>>, vector<1x64xf32>
      tpu.vector_store %arg10[%c0_21, %c0_22], %26 {strides = array<i32>} : memref<1x64xf32, #tpu.memory_space<vmem>>, vector<1x64xf32>,
      %cst_23 = arith.constant 0.000000e+00 : f32
      %28 = vector.broadcast %cst_23 : f32 to vector<8x1xf32>
      %c0_24 = arith.constant 0 : index
      %c0_25 = arith.constant 0 : index
      %29 = vector.load %arg7[%c0_24, %c0_25] : memref<8x1xf32, #tpu.memory_space<vmem>>, vector<8x1xf32>
      tpu.vector_store %arg7[%c0_24, %c0_25], %28 {strides = array<i32>} : memref<8x1xf32, #tpu.memory_space<vmem>>, vector<8x1xf32>,
    } else {
    }
    %c0 = arith.constant 0 : index
    %c0_1 = arith.constant 0 : index
    %3 = vector.load %arg1[%c0, %c0_1] : memref<8x768xbf16, #tpu.memory_space<vmem>>, vector<8x768xbf16>
    %c0_2 = arith.constant 0 : index
    %c0_3 = arith.constant 0 : index
    %4 = vector.load %arg2[%c0_2, %c0_3] : memref<768x64xbf16, #tpu.memory_space<vmem>>, vector<768x64xbf16>
    %cst = arith.constant dense<0.000000e+00> : vector<8x64xf32>
    %5 = tpu.matmul %3, %4, %cst {dimension_numbers = #tpu.dot_dimension_numbers<[1], [0], [0], [1], [0, 0, 1, 1], [], []>} : vector<8x768xbf16>, vector<768x64xbf16>, vector<8x64xf32> -> vector<8x64xf32>
    %c8_i32 = arith.constant 8 : i32
    %6 = arith.muli %arg0, %c8_i32 : i32
    %7 = tpu.assume_multiple %6, 8 : i32
    %8 = arith.index_cast %7 : i32 to index
    %c0_4 = arith.constant 0 : index
    %9 = vector.load %arg8[%8, %c0_4] : memref<8x64xf32, #tpu.memory_space<vmem>>, vector<8x64xf32>
    tpu.vector_store %arg8[%8, %c0_4], %5 {strides = array<i32>} : memref<8x64xf32, #tpu.memory_space<vmem>>, vector<8x64xf32>,
    %c0_5 = arith.constant 0 : index
    %c0_6 = arith.constant 0 : index
    %10 = vector.load %arg9[%c0_5, %c0_6] : memref<1x64xf32, #tpu.memory_space<vmem>>, vector<1x64xf32>
    %cst_7 = arith.constant dense<0.000000e+00> : vector<64xf32>
    %11 = vector.multi_reduction <add>, %5, %cst_7 [0] : vector<8x64xf32> to vector<64xf32>
    %12 = vector.shape_cast %11 : vector<64xf32> to vector<1x64xf32>
    %13 = arith.addf %10, %12 : vector<1x64xf32>
    %c0_8 = arith.constant 0 : index
    %c0_9 = arith.constant 0 : index
    %14 = vector.load %arg9[%c0_8, %c0_9] : memref<1x64xf32, #tpu.memory_space<vmem>>, vector<1x64xf32>
    tpu.vector_store %arg9[%c0_8, %c0_9], %13 {strides = array<i32>} : memref<1x64xf32, #tpu.memory_space<vmem>>, vector<1x64xf32>,
    %c0_10 = arith.constant 0 : index
    %c0_11 = arith.constant 0 : index
    %15 = vector.load %arg10[%c0_10, %c0_11] : memref<1x64xf32, #tpu.memory_space<vmem>>, vector<1x64xf32>
    %16 = arith.mulf %5, %5 : vector<8x64xf32>
    %cst_12 = arith.constant dense<0.000000e+00> : vector<64xf32>
    %17 = vector.multi_reduction <add>, %16, %cst_12 [0] : vector<8x64xf32> to vector<64xf32>
    %18 = vector.shape_cast %17 : vector<64xf32> to vector<1x64xf32>
    %19 = arith.addf %15, %18 : vector<1x64xf32>
    %c0_13 = arith.constant 0 : index
    %c0_14 = arith.constant 0 : index
    %20 = vector.load %arg10[%c0_13, %c0_14] : memref<1x64xf32, #tpu.memory_space<vmem>>, vector<1x64xf32>
    tpu.vector_store %arg10[%c0_13, %c0_14], %19 {strides = array<i32>} : memref<1x64xf32, #tpu.memory_space<vmem>>, vector<1x64xf32>,
    %c0_i32_15 = arith.constant 0 : i32
    %21 = arith.cmpi eq, %arg0, %c0_i32_15 : i32
    %22 = arith.extui %21 : i1 to i32
    %c0_i32_16 = arith.constant 0 : i32
    %23 = arith.cmpi ne, %22, %c0_i32_16 : i32
    scf.if %23 {
      %24 = tpu.iota {dimensions = array<i32: 1>} : vector<4x64xi32>
      %25 = tpu.iota {dimensions = array<i32: 0>} : vector<4x64xi32>
      %c4_i32 = arith.constant 4 : i32
      %c0_i32_17 = arith.constant 0 : i32
      %26 = arith.cmpi eq, %c4_i32, %c0_i32_17 : i32
      %c1_i32 = arith.constant 1 : i32
      %27 = arith.select %26, %c1_i32, %c4_i32 : i32
      %28 = vector.broadcast %27 : i32 to vector<4x64xi32>
      %29 = arith.remsi %24, %28 : vector<4x64xi32>
      %c0_i32_18 = arith.constant 0 : i32
      %30 = vector.broadcast %c0_i32_18 : i32 to vector<4x64xi32>
      %31 = arith.cmpi ne, %29, %30 : vector<4x64xi32>
      %c0_i32_19 = arith.constant 0 : i32
      %32 = vector.broadcast %c0_i32_19 : i32 to vector<4x64xi32>
      %33 = arith.cmpi slt, %29, %32 : vector<4x64xi32>
      %c0_i32_20 = arith.constant 0 : i32
      %34 = arith.cmpi slt, %27, %c0_i32_20 : i32
      %35 = vector.broadcast %34 : i1 to vector<4x64xi1>
      %36 = vector.broadcast %35 : vector<4x64xi1> to vector<4x64xi1>
      %37 = arith.xori %33, %36 : vector<4x64xi1>
      %38 = arith.andi %37, %31 : vector<4x64xi1>
      %39 = vector.broadcast %27 : i32 to vector<4x64xi32>
      %40 = arith.addi %29, %39 : vector<4x64xi32>
      %41 = arith.select %38, %40, %29 : vector<4x64xi1>, vector<4x64xi32>
      %42 = arith.cmpi eq, %41, %25 : vector<4x64xi32>
      %43 = arith.extui %42 : vector<4x64xi1> to vector<4x64xi32>
      %44 = arith.sitofp %43 : vector<4x64xi32> to vector<4x64xf32>
      %45 = tpu.iota {dimensions = array<i32: 0>} : vector<64x4xi32>
      %46 = tpu.iota {dimensions = array<i32: 1>} : vector<64x4xi32>
      %c4_i32_21 = arith.constant 4 : i32
      %c0_i32_22 = arith.constant 0 : i32
      %47 = arith.cmpi eq, %c4_i32_21, %c0_i32_22 : i32
      %c1_i32_23 = arith.constant 1 : i32
      %48 = arith.select %47, %c1_i32_23, %c4_i32_21 : i32
      %49 = vector.broadcast %48 : i32 to vector<64x4xi32>
      %50 = arith.remsi %45, %49 : vector<64x4xi32>
      %c0_i32_24 = arith.constant 0 : i32
      %51 = vector.broadcast %c0_i32_24 : i32 to vector<64x4xi32>
      %52 = arith.cmpi ne, %50, %51 : vector<64x4xi32>
      %c0_i32_25 = arith.constant 0 : i32
      %53 = vector.broadcast %c0_i32_25 : i32 to vector<64x4xi32>
      %54 = arith.cmpi slt, %50, %53 : vector<64x4xi32>
      %c0_i32_26 = arith.constant 0 : i32
      %55 = arith.cmpi slt, %48, %c0_i32_26 : i32
      %56 = vector.broadcast %55 : i1 to vector<64x4xi1>
      %57 = vector.broadcast %56 : vector<64x4xi1> to vector<64x4xi1>
      %58 = arith.xori %54, %57 : vector<64x4xi1>
      %59 = arith.andi %58, %52 : vector<64x4xi1>
      %60 = vector.broadcast %48 : i32 to vector<64x4xi32>
      %61 = arith.addi %50, %60 : vector<64x4xi32>
      %62 = arith.select %59, %61, %50 : vector<64x4xi1>, vector<64x4xi32>
      %63 = arith.cmpi eq, %62, %46 : vector<64x4xi32>
      %64 = arith.extui %63 : vector<64x4xi1> to vector<64x4xi32>
      %65 = arith.sitofp %64 : vector<64x4xi32> to vector<64x4xf32>
      %66 = tpu.iota {dimensions = array<i32: 1>} : vector<8x32xi32>
      %67 = tpu.iota {dimensions = array<i32: 0>} : vector<8x32xi32>
      %c8_i32_27 = arith.constant 8 : i32
      %c0_i32_28 = arith.constant 0 : i32
      %68 = arith.cmpi eq, %c8_i32_27, %c0_i32_28 : i32
      %c1_i32_29 = arith.constant 1 : i32
      %69 = arith.select %68, %c1_i32_29, %c8_i32_27 : i32
      %70 = vector.broadcast %69 : i32 to vector<8x32xi32>
      %71 = arith.remsi %66, %70 : vector<8x32xi32>
      %c0_i32_30 = arith.constant 0 : i32
      %72 = vector.broadcast %c0_i32_30 : i32 to vector<8x32xi32>
      %73 = arith.cmpi ne, %71, %72 : vector<8x32xi32>
      %c0_i32_31 = arith.constant 0 : i32
      %74 = vector.broadcast %c0_i32_31 : i32 to vector<8x32xi32>
      %75 = arith.cmpi slt, %71, %74 : vector<8x32xi32>
      %c0_i32_32 = arith.constant 0 : i32
      %76 = arith.cmpi slt, %69, %c0_i32_32 : i32
      %77 = vector.broadcast %76 : i1 to vector<8x32xi1>
      %78 = vector.broadcast %77 : vector<8x32xi1> to vector<8x32xi1>
      %79 = arith.xori %75, %78 : vector<8x32xi1>
      %80 = arith.andi %79, %73 : vector<8x32xi1>
      %81 = vector.broadcast %69 : i32 to vector<8x32xi32>
      %82 = arith.addi %71, %81 : vector<8x32xi32>
      %83 = arith.select %80, %82, %71 : vector<8x32xi1>, vector<8x32xi32>
      %84 = arith.cmpi eq, %83, %67 : vector<8x32xi32>
      %85 = arith.extui %84 : vector<8x32xi1> to vector<8x32xi32>
      %86 = arith.sitofp %85 : vector<8x32xi32> to vector<8x32xf32>
      %87 = tpu.iota {dimensions = array<i32: 0>} : vector<32x8xi32>
      %88 = tpu.iota {dimensions = array<i32: 1>} : vector<32x8xi32>
      %c8_i32_33 = arith.constant 8 : i32
      %c0_i32_34 = arith.constant 0 : i32
      %89 = arith.cmpi eq, %c8_i32_33, %c0_i32_34 : i32
      %c1_i32_35 = arith.constant 1 : i32
      %90 = arith.select %89, %c1_i32_35, %c8_i32_33 : i32
      %91 = vector.broadcast %90 : i32 to vector<32x8xi32>
      %92 = arith.remsi %87, %91 : vector<32x8xi32>
      %c0_i32_36 = arith.constant 0 : i32
      %93 = vector.broadcast %c0_i32_36 : i32 to vector<32x8xi32>
      %94 = arith.cmpi ne, %92, %93 : vector<32x8xi32>
      %c0_i32_37 = arith.constant 0 : i32
      %95 = vector.broadcast %c0_i32_37 : i32 to vector<32x8xi32>
      %96 = arith.cmpi slt, %92, %95 : vector<32x8xi32>
      %c0_i32_38 = arith.constant 0 : i32
      %97 = arith.cmpi slt, %90, %c0_i32_38 : i32
      %98 = vector.broadcast %97 : i1 to vector<32x8xi1>
      %99 = vector.broadcast %98 : vector<32x8xi1> to vector<32x8xi1>
      %100 = arith.xori %96, %99 : vector<32x8xi1>
      %101 = arith.andi %100, %94 : vector<32x8xi1>
      %102 = vector.broadcast %90 : i32 to vector<32x8xi32>
      %103 = arith.addi %92, %102 : vector<32x8xi32>
      %104 = arith.select %101, %103, %92 : vector<32x8xi1>, vector<32x8xi32>
      %105 = arith.cmpi eq, %104, %88 : vector<32x8xi32>
      %106 = arith.extui %105 : vector<32x8xi1> to vector<32x8xi32>
      %107 = arith.sitofp %106 : vector<32x8xi32> to vector<32x8xf32>
      %c0_39 = arith.constant 0 : index
      %c0_40 = arith.constant 0 : index
      %108 = vector.load %arg6[%c0_39, %c0_40] : memref<9x16xf32, #tpu.memory_space<vmem>>, vector<1x4xf32>
      %c1 = arith.constant 1 : index
      %c0_41 = arith.constant 0 : index
      %109 = vector.load %arg6[%c1, %c0_41] : memref<9x16xf32, #tpu.memory_space<vmem>>, vector<1x4xf32>
      %c2 = arith.constant 2 : index
      %c0_42 = arith.constant 0 : index
      %110 = vector.load %arg6[%c2, %c0_42] : memref<9x16xf32, #tpu.memory_space<vmem>>, vector<1x8xf32>
      %c3 = arith.constant 3 : index
      %c0_43 = arith.constant 0 : index
      %111 = vector.load %arg6[%c3, %c0_43] : memref<9x16xf32, #tpu.memory_space<vmem>>, vector<1x8xf32>
      %c4 = arith.constant 4 : index
      %c0_44 = arith.constant 0 : index
      %112 = vector.load %arg6[%c4, %c0_44] : memref<9x16xf32, #tpu.memory_space<vmem>>, vector<1x16xf32>
      %c5 = arith.constant 5 : index
      %c0_45 = arith.constant 0 : index
      %113 = vector.load %arg6[%c5, %c0_45] : memref<9x16xf32, #tpu.memory_space<vmem>>, vector<1x16xf32>
      %c6 = arith.constant 6 : index
      %c0_46 = arith.constant 0 : index
      %114 = vector.load %arg6[%c6, %c0_46] : memref<9x16xf32, #tpu.memory_space<vmem>>, vector<1x4xf32>
      %c7 = arith.constant 7 : index
      %c0_47 = arith.constant 0 : index
      %115 = vector.load %arg6[%c7, %c0_47] : memref<9x16xf32, #tpu.memory_space<vmem>>, vector<1x4xf32>
      %c8 = arith.constant 8 : index
      %c0_48 = arith.constant 0 : index
      %116 = vector.load %arg6[%c8, %c0_48] : memref<9x16xf32, #tpu.memory_space<vmem>>, vector<1x4xf32>
      %c8_49 = arith.constant 8 : index
      %c4_50 = arith.constant 4 : index
      %117 = vector.load %arg6[%c8_49, %c4_50] : memref<9x16xf32, #tpu.memory_space<vmem>>, vector<1x1xf32>
      %c0_51 = arith.constant 0 : index
      %c0_52 = arith.constant 0 : index
      %118 = vector.load %arg9[%c0_51, %c0_52] : memref<1x64xf32, #tpu.memory_space<vmem>>, vector<1x64xf32>
      %c0_53 = arith.constant 0 : index
      %c0_54 = arith.constant 0 : index
      %119 = vector.load %arg10[%c0_53, %c0_54] : memref<1x64xf32, #tpu.memory_space<vmem>>, vector<1x64xf32>
      %cst_55 = arith.constant dense<0.000000e+00> : vector<1x4xf32>
      %120 = tpu.matmul %118, %65, %cst_55 {dimension_numbers = #tpu.dot_dimension_numbers<[1], [0], [0], [1], [0, 0, 1, 1], [], []>} : vector<1x64xf32>, vector<64x4xf32>, vector<1x4xf32> -> vector<1x4xf32>
      %cst_56 = arith.constant dense<0.000000e+00> : vector<1x4xf32>
      %121 = tpu.matmul %119, %65, %cst_56 {dimension_numbers = #tpu.dot_dimension_numbers<[1], [0], [0], [1], [0, 0, 1, 1], [], []>} : vector<1x64xf32>, vector<64x4xf32>, vector<1x4xf32> -> vector<1x4xf32>
      %cst_57 = arith.constant 1.280000e+02 : f32
      %122 = vector.broadcast %cst_57 : f32 to vector<1x4xf32>
      %123 = arith.divf %120, %122 : vector<1x4xf32>
      %cst_58 = arith.constant 1.280000e+02 : f32
      %124 = vector.broadcast %cst_58 : f32 to vector<1x4xf32>
      %125 = arith.divf %121, %124 : vector<1x4xf32>
      %126 = arith.mulf %123, %123 : vector<1x4xf32>
      %127 = arith.subf %125, %126 : vector<1x4xf32>
      %cst_59 = arith.constant 9.99999974E-6 : f32
      %128 = vector.broadcast %cst_59 : f32 to vector<1x4xf32>
      %129 = arith.addf %127, %128 : vector<1x4xf32>
      %130 = math.rsqrt %129 : vector<1x4xf32>
      %131 = arith.mulf %108, %130 : vector<1x4xf32>
      %132 = arith.mulf %123, %131 : vector<1x4xf32>
      %133 = arith.subf %109, %132 : vector<1x4xf32>
      %cst_60 = arith.constant dense<0.000000e+00> : vector<1x64xf32>
      %134 = tpu.matmul %131, %44, %cst_60 {dimension_numbers = #tpu.dot_dimension_numbers<[1], [0], [0], [1], [0, 0, 1, 1], [], []>} : vector<1x4xf32>, vector<4x64xf32>, vector<1x64xf32> -> vector<1x64xf32>
      %cst_61 = arith.constant dense<0.000000e+00> : vector<1x64xf32>
      %135 = tpu.matmul %133, %44, %cst_61 {dimension_numbers = #tpu.dot_dimension_numbers<[1], [0], [0], [1], [0, 0, 1, 1], [], []>} : vector<1x4xf32>, vector<4x64xf32>, vector<1x64xf32> -> vector<1x64xf32>
      %c0_62 = arith.constant 0 : index
      %c0_63 = arith.constant 0 : index
      %136 = vector.load %arg8[%c0_62, %c0_63] : memref<8x64xf32, #tpu.memory_space<vmem>>, vector<8x64xf32>
      %137 = vector.broadcast %134 : vector<1x64xf32> to vector<8x64xf32>
      %138 = arith.mulf %136, %137 : vector<8x64xf32>
      %139 = vector.broadcast %135 : vector<1x64xf32> to vector<8x64xf32>
      %140 = arith.addf %138, %139 : vector<8x64xf32>
      %cst_64 = arith.constant 0.000000e+00 : f32
      %141 = vector.broadcast %cst_64 : f32 to vector<8x64xf32>
      %142 = arith.maximumf %140, %141 : vector<8x64xf32>
      %143 = arith.truncf %142 : vector<8x64xf32> to vector<8x64xbf16>
      %c0_65 = arith.constant 0 : index
      %c0_66 = arith.constant 0 : index
      %144 = vector.load %arg3[%c0_65, %c0_66] : memref<64x32xbf16, #tpu.memory_space<vmem>>, vector<64x32xbf16>
      %cst_67 = arith.constant dense<0.000000e+00> : vector<8x32xf32>
      %145 = tpu.matmul %143, %144, %cst_67 {dimension_numbers = #tpu.dot_dimension_numbers<[1], [0], [0], [1], [0, 0, 1, 1], [], []>} : vector<8x64xbf16>, vector<64x32xbf16>, vector<8x32xf32> -> vector<8x32xf32>
      %cst_68 = arith.constant dense<0.000000e+00> : vector<32xf32>
      %146 = vector.multi_reduction <add>, %145, %cst_68 [0] : vector<8x32xf32> to vector<32xf32>
      %147 = vector.shape_cast %146 : vector<32xf32> to vector<1x32xf32>
      %148 = arith.mulf %145, %145 : vector<8x32xf32>
      %cst_69 = arith.constant dense<0.000000e+00> : vector<32xf32>
      %149 = vector.multi_reduction <add>, %148, %cst_69 [0] : vector<8x32xf32> to vector<32xf32>
      %150 = vector.shape_cast %149 : vector<32xf32> to vector<1x32xf32>
      %cst_70 = arith.constant dense<0.000000e+00> : vector<1x8xf32>
      %151 = tpu.matmul %147, %107, %cst_70 {dimension_numbers = #tpu.dot_dimension_numbers<[1], [0], [0], [1], [0, 0, 1, 1], [], []>} : vector<1x32xf32>, vector<32x8xf32>, vector<1x8xf32> -> vector<1x8xf32>
      %cst_71 = arith.constant dense<0.000000e+00> : vector<1x8xf32>
      %152 = tpu.matmul %150, %107, %cst_71 {dimension_numbers = #tpu.dot_dimension_numbers<[1], [0], [0], [1], [0, 0, 1, 1], [], []>} : vector<1x32xf32>, vector<32x8xf32>, vector<1x8xf32> -> vector<1x8xf32>
      %cst_72 = arith.constant 3.200000e+01 : f32
      %153 = vector.broadcast %cst_72 : f32 to vector<1x8xf32>
      %154 = arith.divf %151, %153 : vector<1x8xf32>
      %cst_73 = arith.constant 3.200000e+01 : f32
      %155 = vector.broadcast %cst_73 : f32 to vector<1x8xf32>
      %156 = arith.divf %152, %155 : vector<1x8xf32>
      %157 = arith.mulf %154, %154 : vector<1x8xf32>
      %158 = arith.subf %156, %157 : vector<1x8xf32>
      %cst_74 = arith.constant 9.99999974E-6 : f32
      %159 = vector.broadcast %cst_74 : f32 to vector<1x8xf32>
      %160 = arith.addf %158, %159 : vector<1x8xf32>
      %161 = math.rsqrt %160 : vector<1x8xf32>
      %162 = arith.mulf %110, %161 : vector<1x8xf32>
      %163 = arith.mulf %154, %162 : vector<1x8xf32>
      %164 = arith.subf %111, %163 : vector<1x8xf32>
      %cst_75 = arith.constant dense<0.000000e+00> : vector<1x32xf32>
      %165 = tpu.matmul %162, %86, %cst_75 {dimension_numbers = #tpu.dot_dimension_numbers<[1], [0], [0], [1], [0, 0, 1, 1], [], []>} : vector<1x8xf32>, vector<8x32xf32>, vector<1x32xf32> -> vector<1x32xf32>
      %cst_76 = arith.constant dense<0.000000e+00> : vector<1x32xf32>
      %166 = tpu.matmul %164, %86, %cst_76 {dimension_numbers = #tpu.dot_dimension_numbers<[1], [0], [0], [1], [0, 0, 1, 1], [], []>} : vector<1x8xf32>, vector<8x32xf32>, vector<1x32xf32> -> vector<1x32xf32>
      %167 = vector.broadcast %165 : vector<1x32xf32> to vector<8x32xf32>
      %168 = arith.mulf %145, %167 : vector<8x32xf32>
      %169 = vector.broadcast %166 : vector<1x32xf32> to vector<8x32xf32>
      %170 = arith.addf %168, %169 : vector<8x32xf32>
      %cst_77 = arith.constant 0.000000e+00 : f32
      %171 = vector.broadcast %cst_77 : f32 to vector<8x32xf32>
      %172 = arith.maximumf %170, %171 : vector<8x32xf32>
      %173 = arith.truncf %172 : vector<8x32xf32> to vector<8x32xbf16>
      %c0_78 = arith.constant 0 : index
      %c0_79 = arith.constant 0 : index
      %174 = vector.load %arg4[%c0_78, %c0_79] : memref<32x16xbf16, #tpu.memory_space<vmem>>, vector<32x16xbf16>
      %cst_80 = arith.constant dense<0.000000e+00> : vector<8x16xf32>
      %175 = tpu.matmul %173, %174, %cst_80 {dimension_numbers = #tpu.dot_dimension_numbers<[1], [0], [0], [1], [0, 0, 1, 1], [], []>} : vector<8x32xbf16>, vector<32x16xbf16>, vector<8x16xf32> -> vector<8x16xf32>
      %cst_81 = arith.constant dense<0.000000e+00> : vector<16xf32>
      %176 = vector.multi_reduction <add>, %175, %cst_81 [0] : vector<8x16xf32> to vector<16xf32>
      %177 = vector.shape_cast %176 : vector<16xf32> to vector<1x16xf32>
      %178 = arith.mulf %175, %175 : vector<8x16xf32>
      %cst_82 = arith.constant dense<0.000000e+00> : vector<16xf32>
      %179 = vector.multi_reduction <add>, %178, %cst_82 [0] : vector<8x16xf32> to vector<16xf32>
      %180 = vector.shape_cast %179 : vector<16xf32> to vector<1x16xf32>
      %cst_83 = arith.constant 8.000000e+00 : f32
      %181 = vector.broadcast %cst_83 : f32 to vector<1x16xf32>
      %182 = arith.divf %177, %181 : vector<1x16xf32>
      %cst_84 = arith.constant 8.000000e+00 : f32
      %183 = vector.broadcast %cst_84 : f32 to vector<1x16xf32>
      %184 = arith.divf %180, %183 : vector<1x16xf32>
      %185 = arith.mulf %182, %182 : vector<1x16xf32>
      %186 = arith.subf %184, %185 : vector<1x16xf32>
      %cst_85 = arith.constant 9.99999974E-6 : f32
      %187 = vector.broadcast %cst_85 : f32 to vector<1x16xf32>
      %188 = arith.addf %186, %187 : vector<1x16xf32>
      %189 = math.rsqrt %188 : vector<1x16xf32>
      %190 = arith.mulf %112, %189 : vector<1x16xf32>
      %191 = arith.mulf %182, %190 : vector<1x16xf32>
      %192 = arith.subf %113, %191 : vector<1x16xf32>
      %193 = vector.broadcast %190 : vector<1x16xf32> to vector<8x16xf32>
      %194 = arith.mulf %175, %193 : vector<8x16xf32>
      %195 = vector.broadcast %192 : vector<1x16xf32> to vector<8x16xf32>
      %196 = arith.addf %194, %195 : vector<8x16xf32>
      %cst_86 = arith.constant 0.000000e+00 : f32
      %197 = vector.broadcast %cst_86 : f32 to vector<8x16xf32>
      %198 = arith.maximumf %196, %197 : vector<8x16xf32>
      %199 = arith.truncf %198 : vector<8x16xf32> to vector<8x16xbf16>
      %c0_87 = arith.constant 0 : index
      %c0_88 = arith.constant 0 : index
      %200 = vector.load %arg5[%c0_87, %c0_88] : memref<16x4xbf16, #tpu.memory_space<vmem>>, vector<16x4xbf16>
      %cst_89 = arith.constant dense<0.000000e+00> : vector<8x4xf32>
      %201 = tpu.matmul %199, %200, %cst_89 {dimension_numbers = #tpu.dot_dimension_numbers<[1], [0], [0], [1], [0, 0, 1, 1], [], []>} : vector<8x16xbf16>, vector<16x4xbf16>, vector<8x4xf32> -> vector<8x4xf32>
      %cst_90 = arith.constant dense<0.000000e+00> : vector<4xf32>
      %202 = vector.multi_reduction <add>, %201, %cst_90 [0] : vector<8x4xf32> to vector<4xf32>
      %203 = vector.shape_cast %202 : vector<4xf32> to vector<1x4xf32>
      %204 = arith.mulf %201, %201 : vector<8x4xf32>
      %cst_91 = arith.constant dense<0.000000e+00> : vector<4xf32>
      %205 = vector.multi_reduction <add>, %204, %cst_91 [0] : vector<8x4xf32> to vector<4xf32>
      %206 = vector.shape_cast %205 : vector<4xf32> to vector<1x4xf32>
      %cst_92 = arith.constant 8.000000e+00 : f32
      %207 = vector.broadcast %cst_92 : f32 to vector<1x4xf32>
      %208 = arith.divf %203, %207 : vector<1x4xf32>
      %cst_93 = arith.constant 8.000000e+00 : f32
      %209 = vector.broadcast %cst_93 : f32 to vector<1x4xf32>
      %210 = arith.divf %206, %209 : vector<1x4xf32>
      %211 = arith.mulf %208, %208 : vector<1x4xf32>
      %212 = arith.subf %210, %211 : vector<1x4xf32>
      %cst_94 = arith.constant 9.99999974E-6 : f32
      %213 = vector.broadcast %cst_94 : f32 to vector<1x4xf32>
      %214 = arith.addf %212, %213 : vector<1x4xf32>
      %215 = math.rsqrt %214 : vector<1x4xf32>
      %216 = arith.mulf %114, %215 : vector<1x4xf32>
      %217 = arith.mulf %208, %216 : vector<1x4xf32>
      %218 = arith.subf %115, %217 : vector<1x4xf32>
      %219 = vector.broadcast %216 : vector<1x4xf32> to vector<8x4xf32>
      %220 = arith.mulf %201, %219 : vector<8x4xf32>
      %221 = vector.broadcast %218 : vector<1x4xf32> to vector<8x4xf32>
      %222 = arith.addf %220, %221 : vector<8x4xf32>
      %cst_95 = arith.constant 0.000000e+00 : f32
      %223 = vector.broadcast %cst_95 : f32 to vector<8x4xf32>
      %224 = arith.maximumf %222, %223 : vector<8x4xf32>
      %225 = vector.broadcast %116 : vector<1x4xf32> to vector<8x4xf32>
      %226 = arith.mulf %224, %225 : vector<8x4xf32>
      %cst_96 = arith.constant dense<0.000000e+00> : vector<8xf32>
      %227 = vector.multi_reduction <add>, %226, %cst_96 [1] : vector<8x4xf32> to vector<8xf32>
      %228 = vector.shape_cast %227 : vector<8xf32> to vector<8x1xf32>
      %229 = vector.broadcast %117 : vector<1x1xf32> to vector<8x1xf32>
      %230 = arith.addf %228, %229 : vector<8x1xf32>
      %c0_97 = arith.constant 0 : index
      %c0_98 = arith.constant 0 : index
      %231 = vector.load %arg7[%c0_97, %c0_98] : memref<8x1xf32, #tpu.memory_space<vmem>>, vector<8x1xf32>
      tpu.vector_store %arg7[%c0_97, %c0_98], %230 {strides = array<i32>} : memref<8x1xf32, #tpu.memory_space<vmem>>, vector<8x1xf32>,
    } else {
    }
    return
  }
  func.func @transform_0(%arg0: i32) -> (i32, i32) {
    %c0_i32 = arith.constant 0 : i32
    %c0_i32_0 = arith.constant 0 : i32
    return %arg0, %c0_i32 : i32, i32
  }
  func.func @transform_1(%arg0: i32) -> (i32, i32) {
    %c0_i32 = arith.constant 0 : i32
    %c0_i32_0 = arith.constant 0 : i32
    %c0_i32_1 = arith.constant 0 : i32
    return %c0_i32, %c0_i32_0 : i32, i32
  }
  func.func @transform_2(%arg0: i32) -> (i32, i32) {
    %c0_i32 = arith.constant 0 : i32
    %c0_i32_0 = arith.constant 0 : i32
    %c0_i32_1 = arith.constant 0 : i32
    return %c0_i32, %c0_i32_0 : i32, i32
  }
  func.func @transform_3(%arg0: i32) -> (i32, i32) {
    %c0_i32 = arith.constant 0 : i32
    %c0_i32_0 = arith.constant 0 : i32
    %c0_i32_1 = arith.constant 0 : i32
    return %c0_i32, %c0_i32_0 : i32, i32
  }
  func.func @transform_4(%arg0: i32) -> (i32, i32) {
    %c0_i32 = arith.constant 0 : i32
    %c0_i32_0 = arith.constant 0 : i32
    %c0_i32_1 = arith.constant 0 : i32
    return %c0_i32, %c0_i32_0 : i32, i32
  }
  func.func @transform_5(%arg0: i32) -> (i32, i32) {
    %c0_i32 = arith.constant 0 : i32
    %c0_i32_0 = arith.constant 0 : i32
    %c0_i32_1 = arith.constant 0 : i32
    return %c0_i32, %c0_i32_0 : i32, i32
  }
  func.func @transform_6(%arg0: i32) -> (i32, i32) {
    %c0_i32 = arith.constant 0 : i32
    %c0_i32_0 = arith.constant 0 : i32
    %c0_i32_1 = arith.constant 0 : i32
    return %c0_i32, %c0_i32_0 : i32, i32
  }
}

</mosaic_0001>

<bundles_post_ra>
// kernel: build_cnn4_forward.1
= control target key start
LH: loop header
LB: loop body
LE: loop exit
PB: predicated region body
PF: predicated region fallthrough
CT: control target
= control target key end

     0   :  { %vm28_vm0 = vcmask 516096   ;;  %v2194_v57 = vmov 0.0   ;;  %v590_v58 = vlaneseq  ;;  %vm2197_vm13 = vmmov 0   ;;  %s2199_s30 = smov 124   ;;  %s2716_s1 = inlined_call_operand.vmem [shape: bf16[768,64], index: 1, kind: input, shape index: {}]   ;;  %s2717_s0 = inlined_call_operand.vmem [shape: bf16[8,768], index: 0, kind: input, shape index: {}]   ;;  %s2718_s2 = inlined_call_operand.vmem [shape: bf16[64,32], index: 2, kind: input, shape index: {}]   ;;  %s2719_s5 = inlined_call_operand.vmem [shape: f32[9,16], index: 5, kind: input, shape index: {}]   ;;  %s2720_s3 = inlined_call_operand.vmem [shape: bf16[32,16], index: 3, kind: input, shape index: {}]   ;;  %s2721_s4 = inlined_call_operand.vmem [shape: bf16[16,4], index: 4, kind: input, shape index: {}]   ;;  %s2722_s6 = inlined_call_operand.vmem [shape: f32[8,1], index: 6, kind: output, shape index: {}]  }
   0x1   :  { %v2125_v0 = vld [vmem:[%s2716_s1 + $0x40] sm:$0xff]   ;;  %v2129_v4 = vld [vmem:[%s2716_s1 + $0x48] sm:$0xff]   ;;  %v2133_v8 = vld [vmem:[%s2716_s1 + $0x50] sm:$0xff]   ;;  %29 = vst.msk [vmem:[#allocation3] sm:$0x1] %vm28_vm0, %v2194_v57  ;;  %vm563_vm14 = vcmask 523264  }
   0x2   :  { %v2126_v1 = vld [vmem:[%s2716_s1 + $0xc0] sm:$0xff]   ;;  %1865 = vmatprep.subr.bf16.mxu0 %v2125_v0  ;;  %v2130_v5 = vld [vmem:[%s2716_s1 + $0xc8] sm:$0xff]   ;;  %v2134_v9 = vld [vmem:[%s2716_s1 + $0xd0] sm:$0xff]   ;;  %30 = vst.msk [vmem:[#allocation4] sm:$0x1] %vm28_vm0, %v2194_v57  ;;  %v2393_v59 = vshrl.u32 %v590_v58, 7 }
   0x3   :  { %v2127_v2 = vld [vmem:[%s2716_s1] sm:$0xff]   ;;  %1887 = vmatprep.subr.bf16.mxu1 %v2126_v1  ;;  %v2131_v6 = vld [vmem:[%s2716_s1 + $0x8] sm:$0xff]   ;;  %v2135_v10 = vld [vmem:[%s2716_s1 + $0x10] sm:$0xff]   ;;  %v2398_v61 = vand.u32 127, %v590_v58  ;;  %vm982_vm15 = vcmask 1043456  }
   0x4   :  { %v2128_v3 = vld [vmem:[%s2716_s1 + $0x80] sm:$0xff]   ;;  %1866 = vmatpush3.bf16.msra.mxu0 %v2127_v2  ;;  %v2132_v7 = vld [vmem:[%s2716_s1 + $0x88] sm:$0xff]   ;;  %v2136_v11 = vld [vmem:[%s2716_s1 + $0x90] sm:$0xff]   ;;  %v2396_v60 = vadd.s32 8, %v2393_v59  ;;  %v620_v62 = vand.u32 3, %v2393_v59  ;;  %v2413_v2 = vadd.s32 16, %v2393_v59 }
   0x5   :  { %1888 = vmatpush3.bf16.msra.mxu1 %v2128_v3  ;;  %1867 = vmatprep.subr.bf16.mxu0 %v2129_v4  ;;  %v2137_v12 = vld [vmem:[%s2716_s1 + $0x58] sm:$0xff]   ;;  %v2141_v16 = vld [vmem:[%s2716_s1 + $0x60] sm:$0xff]   ;;  %v2145_v20 = vld [vmem:[%s2716_s1 + $0x68] sm:$0xff]   ;;  %v2195_v3 = vmov 0.0|0.0   ;;  %v2421_v4 = vadd.s32 24, %v2393_v59  ;;  %v598_v0 = vand.u32 3, %v2398_v61 }
   0x6   :  { %1889 = vmatprep.subr.bf16.mxu1 %v2130_v5  ;;  %v2138_v13 = vld [vmem:[%s2716_s1 + $0xd8] sm:$0xff]   ;;  %v2142_v17 = vld [vmem:[%s2716_s1 + $0xe0] sm:$0xff]   ;;  %v2146_v21 = vld [vmem:[%s2716_s1 + $0xe8] sm:$0xff]   ;;  %v627_v63 = vand.u32 3, %v2396_v60  ;;  %vm2403_vm1 = vcmp.eq.s32.totalorder %v620_v62, %v2398_v61  ;;  %v2196_v5 = vmov 1.0|1.0  }
   0x7   :  { %v2139_v14 = vld [vmem:[%s2716_s1 + $0x18] sm:$0xff]   ;;  %v2143_v18 = vld [vmem:[%s2716_s1 + $0x20] sm:$0xff]   ;;  %v2147_v22 = vld [vmem:[%s2716_s1 + $0x28] sm:$0xff]  }
   0x8   :  { %1868 = vmatpush3.bf16.msra.mxu0 %v2131_v6  ;;  %v2140_v15 = vld [vmem:[%s2716_s1 + $0x98] sm:$0xff]   ;;  %v2144_v19 = vld [vmem:[%s2716_s1 + $0xa0] sm:$0xff]   ;;  %v2148_v23 = vld [vmem:[%s2716_s1 + $0xa8] sm:$0xff]   ;;  %vm2408_vm2 = vcmp.eq.s32.totalorder %v627_v63, %v2398_v61  ;;  %v634_v6 = vand.u32 3, %v2413_v2 }
   0x9   :  { %1890 = vmatpush3.bf16.msra.mxu1 %v2132_v7  ;;  %1869 = vmatprep.subr.bf16.mxu0 %v2133_v8  ;;  %v2149_v24 = vld [vmem:[%s2716_s1 + $0x70] sm:$0xff]   ;;  %v2153_v28 = vld [vmem:[%s2716_s1 + $0x78] sm:$0xff]   ;;  %v33_v32 = vld [vmem:[%s2717_s0] sm:$0xff]  ;;  %v641_v7 = vand.u32 3, %v2421_v4 }
   0xa   :  { %1891 = vmatprep.subr.bf16.mxu1 %v2134_v9  ;;  %v2150_v25 = vld [vmem:[%s2716_s1 + $0xf0] sm:$0xff]   ;;  %v2154_v29 = vld [vmem:[%s2716_s1 + $0xf8] sm:$0xff]   ;;  %v34_v33 = vld [vmem:[%s2717_s0 + $0x8] sm:$0xff]  ;;  %v1750_v34 = vcombine.low %v33_v32, %v33_v32  ;;  %v1751_v35 = vcombine.high %v33_v32, %v33_v32  ;;  %vm2433_vm4 = vcmp.eq.s32.totalorder %v634_v6, %v2398_v61  ;;  %v612_v9 = vadd.s32 32, %v2393_v59 }
   0xb   :  { %v2151_v26 = vld [vmem:[%s2716_s1 + $0x30] sm:$0xff]   ;;  %v2155_v30 = vld [vmem:[%s2716_s1 + $0x38] sm:$0xff]   ;;  %v1752_v36 = vcombine.low %v34_v33, %v34_v33  ;;  %v1753_v37 = vcombine.high %v34_v33, %v34_v33  ;;  %v2161_v38 = vld [vmem:[%s2716_s1 + $0x140] sm:$0xff]   ;;  %vm2440_vm5 = vcmp.eq.s32.totalorder %v641_v7, %v2398_v61 }
   0xc   :  { %1870 = vmatpush3.bf16.msra.mxu0 %v2135_v10  ;;  %v2152_v27 = vld [vmem:[%s2716_s1 + $0xb0] sm:$0xff]   ;;  %v2156_v31 = vld [vmem:[%s2716_s1 + $0xb8] sm:$0xff]   ;;  %v2162_v39 = vld [vmem:[%s2716_s1 + $0x100] sm:$0xff]   ;;  %473 = vmatprep.mubr.bf16.mxu0 %v1751_v35  ;;  %v613_v10 = vadd.s32 40, %v2393_v59 }
   0xd   :  { %1892 = vmatpush3.bf16.msra.mxu1 %v2136_v11  ;;  %1871 = vmatprep.subr.bf16.mxu0 %v2137_v12  ;;  %v2163_v40 = vld [vmem:[%s2716_s1 + $0x148] sm:$0xff]   ;;  %v2165_v42 = vld [vmem:[%s2716_s1 + $0x150] sm:$0xff]   ;;  %v2167_v44 = vld [vmem:[%s2716_s1 + $0x158] sm:$0xff]   ;;  %v648_v12 = vand.u32 3, %v612_v9 }
   0xe   :  { %1893 = vmatprep.subr.bf16.mxu1 %v2138_v13  ;;  %513 = vmatprep.mubr.bf16.mxu1 %v1753_v37  ;;  %v2164_v41 = vld [vmem:[%s2716_s1 + $0x108] sm:$0xff]   ;;  %v2166_v43 = vld [vmem:[%s2716_s1 + $0x110] sm:$0xff]   ;;  %v2168_v45 = vld [vmem:[%s2716_s1 + $0x118] sm:$0xff]   ;;  %v655_v13 = vand.u32 3, %v613_v10 }
   0xf   :  { %v2169_v46 = vld [vmem:[%s2716_s1 + $0x160] sm:$0xff]   ;;  %v35_v47 = vld [vmem:[%s2717_s0 + $0x10] sm:$0xff]  ;;  %v2171_v50 = vld [vmem:[%s2716_s1 + $0x168] sm:$0xff]   ;;  %vm2456_vm7 = vcmp.eq.s32.totalorder %v648_v12, %v2398_v61 }
  0x10   :  { %1872 = vmatpush3.bf16.msra.mxu0 %v2139_v14  ;;  %v1755_v48 = vcombine.high %v35_v47, %v35_v47  ;;  %v2170_v49 = vld [vmem:[%s2716_s1 + $0x120] sm:$0xff]   ;;  %v2172_v51 = vld [vmem:[%s2716_s1 + $0x128] sm:$0xff]   ;;  %v2173_v52 = vld [vmem:[%s2716_s1 + $0x170] sm:$0xff]   ;;  %v1754_v56 = vcombine.low %v35_v47, %v35_v47  ;;  %vm2461_vm8 = vcmp.eq.s32.totalorder %v655_v13, %v2398_v61 }
  0x11   :  { %1894 = vmatpush3.bf16.msra.mxu1 %v2140_v15  ;;  %1873 = vmatprep.subr.bf16.mxu0 %v2141_v16  ;;  %v2174_v53 = vld [vmem:[%s2716_s1 + $0x130] sm:$0xff]   ;;  %v2175_v54 = vld [vmem:[%s2716_s1 + $0x178] sm:$0xff]   ;;  %vm2084_vm3 = vmpackc.low %vm2408_vm2, %vm2403_vm1  ;;  %v614_v16 = vadd.s32 48, %v2393_v59  ;;  %vm978_vm1 = vcmask 31744  }
  0x12   :  { %1895 = vmatprep.subr.bf16.mxu1 %v2142_v17  ;;  %v2176_v55 = vld [vmem:[%s2716_s1 + $0x138] sm:$0xff]   ;;  %vm2087_vm6 = vmpackc.low %vm2440_vm5, %vm2433_vm4  ;;  %v615_v17 = vadd.s32 56, %v2393_v59  ;;  %v811_v15 = vld [vmem:[%s2719_s5] sm:$0x1] }
  0x13   :  { %vm2090_vm9 = vmpackc.low %vm2461_vm8, %vm2456_vm7  ;;  %vm1217_vm8 = vcmask 261120  }
  0x14   :  { %1874 = vmatpush3.bf16.msra.mxu0 %v2143_v18  ;;  %v662_v18 = vand.u32 3, %v614_v16 }
  0x15   :  { %1896 = vmatpush3.bf16.msra.mxu1 %v2144_v19  ;;  %1875 = vmatprep.subr.bf16.mxu0 %v2145_v20  ;;  %v669_v19 = vand.u32 3, %v615_v17  ;;  %v2179_v17 = vld [vmem:[%s2718_s2] sm:$0xff]  }
  0x16   :  { %1897 = vmatprep.subr.bf16.mxu1 %v2146_v21  ;;  %vm2479_vm10 = vcmp.eq.s32.totalorder %v662_v18, %v2398_v61 }
  0x17   :  { %vm2484_vm11 = vcmp.eq.s32.totalorder %v669_v19, %v2398_v61  ;;  %v812_v19 = vld [vmem:[%s2719_s5 + $0x1] sm:$0x1] }
  0x18   :  { %1876 = vmatpush3.bf16.msra.mxu0 %v2147_v22  ;;  %vm2093_vm12 = vmpackc.low %vm2484_vm11, %vm2479_vm10  ;;  %vm1389_vm10 = vcmask 64512   ;;  %vm1607_vm11 = vcmask 130048  }
  0x19   :  { %1898 = vmatpush3.bf16.msra.mxu1 %v2148_v23  ;;  %1877 = vmatprep.subr.bf16.mxu0 %v2149_v24 }
  0x1a   :  { %1899 = vmatprep.subr.bf16.mxu1 %v2150_v25 }
  0x1c   :  { %1878 = vmatpush3.bf16.msra.mxu0 %v2151_v26 }
  0x1d   :  { %1900 = vmatpush3.bf16.msra.mxu1 %v2152_v27  ;;  %1879 = vmatprep.subr.bf16.mxu0 %v2153_v28 }
  0x1e   :  { %1901 = vmatprep.subr.bf16.mxu1 %v2154_v29 }
  0x20   :  { %1880 = vmatpush3.bf16.msra.mxu0 %v2155_v30 }
  0x21   :  { %1902 = vmatpush3.bf16.msra.mxu1 %v2156_v31  ;;  %1909 = vmatprep.subr.bf16.mxu0 %v2161_v38 }
  0x22   :  { %2083 = vmatprep.subr.bf16.mxu1 %v2195_v3 }
  0x23   :  { %474 = vmatmul.mubr.bf16.vlgmr.msra.gmra.mrb[0].mxu0 %v1750_v34 }
  0x24   :  { %514 = vmatmul.mubr.bf16.vlgmr.msra.gmra.mrb[0].mxu1 %v1752_v36  ;;  %1910 = vmatpush3.bf16.msra.mxu0 %v2162_v39 }
  0x25   :  { %1911 = vmatprep.subr.bf16.mxu0 %v2163_v40  ;;  %553 = vmatprep.mubr.bf16.mxu0 %v1755_v48 }
  0x26   :  { %2085 = vmatpush3.bf16.msk.msra.mxu1 %vm2084_vm3, %v2196_v5  ;;  %1993 = vmatprep.mubr.msk.f32.mxu1 %vm2197_vm13, %v2194_v57 }
  0x27   :  { %2086 = vmatprep.subr.bf16.mxu1 %v2195_v3 }
  0x28   :  { %1912 = vmatpush3.bf16.msra.mxu0 %v2164_v41 }
  0x29   :  { %1913 = vmatprep.subr.bf16.mxu0 %v2165_v42 }
  0x2a   :  { %2088 = vmatpush3.bf16.msk.msra.mxu1 %vm2087_vm6, %v2196_v5 }
  0x2b   :  { %2089 = vmatprep.subr.bf16.mxu1 %v2195_v3 }
  0x2c   :  { %1914 = vmatpush3.bf16.msra.mxu0 %v2166_v43 }
  0x2d   :  { %1915 = vmatprep.subr.bf16.mxu0 %v2167_v44 }
  0x2e   :  { %2091 = vmatpush3.bf16.msk.msra.mxu1 %vm2090_vm9, %v2196_v5 }
  0x2f   :  { %2092 = vmatprep.subr.bf16.mxu1 %v2195_v3 }
  0x30   :  { %1916 = vmatpush3.bf16.msra.mxu0 %v2168_v45 }
  0x31   :  { %1917 = vmatprep.subr.bf16.mxu0 %v2169_v46 }
  0x32   :  { %2094 = vmatpush3.bf16.msk.msra.mxu1 %vm2093_vm12, %v2196_v5 }
  0x33   :  { %2095 = vmatprep.subr.bf16.mxu1 %v2195_v3 }
  0x34   :  { %1918 = vmatpush3.bf16.msra.mxu0 %v2170_v49 }
  0x35   :  { %1919 = vmatprep.subr.bf16.mxu0 %v2171_v50 }
  0x38   :  { %1920 = vmatpush3.bf16.msra.mxu0 %v2172_v51  ;;  %v565_v51 = vld [vmem:[#allocation3] sm:$0x1] }
  0x39   :  { %1921 = vmatprep.subr.bf16.mxu0 %v2173_v52 }
  0x3c   :  { %1922 = vmatpush3.bf16.msra.mxu0 %v2174_v53 }
  0x3d   :  { %1923 = vmatprep.subr.bf16.mxu0 %v2175_v54  ;;  %v576_v54 = vld [vmem:[#allocation4] sm:$0x1] }
  0x40   :  { %1924 = vmatpush3.bf16.msra.mxu0 %v2176_v55 }
  0x41   :  { %2020 = vmatprep.subr.mxu0 %v2194_v57 }
  0x43   :  { %554 = vmatmul.mubr.bf16.vlgmr.msra.gmra.mrb[4].mxu0 %v1754_v56 }
  0x44   :  { %2022 = vmatprep.mubr.msk.f32.mxu0 %vm2197_vm13, %v2194_v57 }
  0xf6   :  { %v1881_v22 = vpop.f32.mrb[0].mxu0 }
  0xf7   :  { %v1903_v23 = vpop.f32.mrb[0].mxu1  ;;  %v1882_v24 = vpop.f32.mrb[1].mxu0 }
  0xf8   :  { %v1904_v25 = vpop.f32.mrb[1].mxu1  ;;  %v1883_v26 = vadd.f32 %v1882_v24, %v1881_v22  ;;  %v1884_v28 = vpop.f32.mrb[2].mxu0  ;;  %v2180_v22 = vld [vmem:[%s2718_s2 + $0x8] sm:$0xff]   ;;  %v2182_v24 = vld [vmem:[%s2718_s2 + $0x18] sm:$0xff]  }
  0xf9   :  { %v1905_v27 = vadd.f32 %v1904_v25, %v1903_v23  ;;  %v1906_v29 = vpop.f32.mrb[2].mxu1  ;;  %v1885_v30 = vpop.f32.mrb[3].mxu0  ;;  %v2181_v23 = vld [vmem:[%s2718_s2 + $0x10] sm:$0xff]   ;;  %v2576_v25 = vsub.s32 0, %v2393_v59 }
  0xfa   :  { %v1907_v31 = vpop.f32.mrb[3].mxu1 }
  0xfb   :  { %v516_v32 = vadd.f32 %v1905_v27, %v1883_v26 }
 0x116   :  { %v1925_v33 = vpop.f32.mrb[4].mxu0 }
 0x117   :  { %v1926_v34 = vpop.f32.mrb[5].mxu0 }
 0x118   :  { %v1927_v35 = vadd.f32 %v1926_v34, %v1925_v33  ;;  %v1928_v36 = vpop.f32.mrb[6].mxu0 }
 0x119   :  { %v1929_v37 = vpop.f32.mrb[7].mxu0 }
 0x11a   :  { %v556_v38 = vadd.f32 %v1927_v35, %v516_v32  ;;  %v755_v37 = vand.u32 7, %v2393_v59 }
 0x11c   :  { %564 = vst.msk [vmem:[#allocation2] sm:$0xff] %vm563_vm14, %v556_v38  ;;  %v566_v39 = vsel %vm563_vm14, %v556_v38, 0.0  ;;  %v577_v40 = vmul.f32 %v556_v38, %v556_v38  ;;  %v762_v38 = vand.u32 7, %v2396_v60  ;;  %vm2586_vm2 = vcmp.eq.s32.totalorder %v755_v37, %v2398_v61 }
 0x11d   :  { %v567_v41 = vrot.slane %v566_v39, 4  ;;  %v769_v60 = vand.u32 7, %v2413_v2 }
 0x11e   :  { %v578_v42 = vsel %vm563_vm14, %v577_v40, 0.0 }
 0x11f   :  { %v568_v43 = vadd.f32 %v567_v41, %v566_v39  ;;  %v579_v44 = vrot.slane %v578_v42, 4  ;;  %v776_v41 = vand.u32 7, %v2421_v4  ;;  %vm2609_vm5 = vcmp.eq.s32.totalorder %v769_v60, %v2398_v61 }
 0x121   :  { %v569_v45 = vrot.slane %v568_v43, 2  ;;  %v580_v46 = vadd.f32 %v579_v44, %v578_v42 }
 0x123   :  { %v570_v47 = vadd.f32 %v569_v45, %v568_v43  ;;  %v581_v48 = vrot.slane %v580_v46, 2  ;;  %v1129_v29 = vld [vmem:[#allocation2] sm:$0xff] }
 0x125   :  { %v571_v49 = vrot.slane %v570_v47, 1  ;;  %v582_v50 = vadd.f32 %v581_v48, %v580_v46 }
 0x127   :  { %v572_v52 = vadd.f32 %v571_v49, %v570_v47  ;;  %v583_v53 = vrot.slane %v582_v50, 1 }
 0x129   :  { %v573_v55 = vadd.f32 %v572_v52, %v565_v51  ;;  %v584_v56 = vadd.f32 %v583_v53, %v582_v50 }
 0x12b   :  { %575 = vst.msk [vmem:[#allocation3] sm:$0x1] %vm28_vm0, %v573_v55  ;;  %v585_v58 = vadd.f32 %v584_v56, %v576_v54 }
 0x12d   :  { %586 = vst.msk [vmem:[#allocation4] sm:$0x1] %vm28_vm0, %v585_v58  ;;  %vm606_vm0 = vcmp.eq.s32.totalorder %v598_v0, %v2393_v59 }
 0x12e   :  { %v1804_v1 = vsel %vm606_vm0, 1.0, %v2194_v57 }
 0x12f   :  { %2021 = vmatpush3.msk.msra.mxu0 %vm982_vm15, %v1804_v1 }
 0x130   :  { %2107 = vmatprep.subr.bf16.mxu0 %v2195_v3 }
 0x132   :  { %v820_v62 = vld [vmem:[#allocation3] sm:$0x1] }
 0x133   :  { %1994 = vmatmul.mubr.msk.f32.vlgmr.msra.gmra.mrb[4].mxu1 %vm563_vm14, %v820_v62 }
 0x134   :  { %2097 = vmatpush3.bf16.msk.msra.mxu1 %vm2084_vm3, %v2196_v5  ;;  %2012 = vmatprep.mubr.msk.f32.mxu1 %vm2197_vm13, %v2194_v57  ;;  %v821_v63 = vld [vmem:[#allocation4] sm:$0x1]  ;;  %vm2591_vm3 = vcmp.eq.s32.totalorder %v762_v38, %v2398_v61 }
 0x135   :  { %2098 = vmatprep.subr.bf16.mxu1 %v2195_v3  ;;  %vm2108_vm4 = vmpackc.low %vm2591_vm3, %vm2586_vm2 }
 0x138   :  { %2100 = vmatpush3.bf16.msk.msra.mxu1 %vm2087_vm6, %v2196_v5  ;;  %vm2614_vm6 = vcmp.eq.s32.totalorder %v776_v41, %v2398_v61 }
 0x139   :  { %2101 = vmatprep.subr.bf16.mxu1 %v2195_v3  ;;  %vm2111_vm7 = vmpackc.low %vm2614_vm6, %vm2609_vm5 }
 0x13c   :  { %2103 = vmatpush3.bf16.msk.msra.mxu1 %vm2090_vm9, %v2196_v5 }
 0x13d   :  { %2104 = vmatprep.subr.bf16.mxu1 %v2195_v3 }
 0x140   :  { %2106 = vmatpush3.bf16.msk.msra.mxu1 %vm2093_vm12, %v2196_v5  ;;  %vm31_vm12 = vcmask 7168  }
 0x141   :  { %2015 = vmatprep.subr.mxu1 %v2194_v57  ;;  %32 = vst.msk [vmem:[%s2722_s6] sm:$0xff] %vm31_vm12, %v2194_v57 }
 0x143   :  { %2013 = vmatmul.mubr.msk.f32.vlgmr.msra.gmra.mrb[6].mxu1 %vm563_vm14, %v821_v63 }
 0x144   :  { %2017 = vmatprep.mubr.msk.f32.mxu1 %vm2197_vm13, %v2194_v57  ;;  %2016 = vmatpush3.msk.msra.mxu1 %vm982_vm15, %v1804_v1  ;;  %v740_v1 = vand.u32 7, %v2398_v61 }
 0x145   :  { %2025 = vmatprep.subr.bf16.mxu1 %v2194_v57 }
 0x146   :  { %vm748_vm9 = vcmp.eq.s32.totalorder %v740_v1, %v2393_v59  ;;  %v813_v59 = vld [vmem:[%s2719_s5 + $0x2] sm:$0x1] }
 0x206   :  { %v891_v6 = vpop.f32.mrb[4].mxu1 }
 0x207   :  { %v1995_v7 = vpop.f32.mrb[5].mxu1  ;;  %v969_v8 = vmul.f32 0.0078125, %v891_v6 }
 0x209   :  { %v971_v10 = vmul.f32 %v969_v8, %v969_v8 }
 0x216   :  { %v964_v9 = vpop.f32.mrb[6].mxu1 }
 0x217   :  { %v970_v11 = vmul.f32 0.0078125, %v964_v9  ;;  %v2014_v12 = vpop.f32.mrb[7].mxu1 }
 0x219   :  { %v972_v13 = vsub.f32 %v970_v11, %v971_v10 }
 0x21b   :  { %v973_v14 = vadd.f32 1e-05, %v972_v13 }
 0x21d   :  { %2186 = vrsqrt.f32 %v973_v14 }
 0x227   :  { %v2187_v16 = vpop.eup %2186 }
 0x228   :  { %v975_v18 = vmul.f32 %v2187_v16, %v811_v15  ;;  %v814_v15 = vld [vmem:[%s2719_s5 + $0x3] sm:$0x1] }
 0x22a   :  { %2018 = vmatmul.mubr.msk.f32.vlgmr.msra.gmra.mrb[8].mxu1 %vm978_vm1, %v975_v18  ;;  %v976_v20 = vmul.f32 %v975_v18, %v969_v8  ;;  %v2183_v18 = vld [vmem:[%s2720_s3] sm:$0xff]  }
 0x22b   :  { %2026 = vmatpush3.bf16.msra.mxu1 %v2179_v17  ;;  %2033 = vmatprep.mubr.msk.bf16.mxu1 %vm2197_vm13, %v2194_v57 }
 0x22c   :  { %v977_v21 = vsub.f32 %v812_v19, %v976_v20  ;;  %2027 = vmatprep.subr.bf16.mxu1 %v2194_v57  ;;  %v2184_v19 = vld [vmem:[%s2720_s3 + $0x8] sm:$0xff]  }
 0x22e   :  { %2023 = vmatmul.mubr.msk.f32.vlgmr.msra.gmra.mrb[8].mxu0 %vm978_vm1, %v977_v21 }
 0x22f   :  { %2045 = vmatprep.mubr.msk.f32.mxu0 %vm2197_vm13, %v2194_v57  ;;  %2028 = vmatpush3.bf16.msra.mxu1 %v2180_v22 }
 0x230   :  { %2029 = vmatprep.subr.bf16.mxu1 %v2194_v57  ;;  %2109 = vmatpush3.bf16.msk.msra.mxu0 %vm2108_vm4, %v2196_v5 }
 0x231   :  { %2110 = vmatprep.subr.bf16.mxu0 %v2195_v3 }
 0x233   :  { %2030 = vmatpush3.bf16.msra.mxu1 %v2181_v23 }
 0x234   :  { %2031 = vmatprep.subr.bf16.mxu1 %v2194_v57  ;;  %2112 = vmatpush3.bf16.msk.msra.mxu0 %vm2111_vm7, %v2196_v5 }
 0x235   :  { %2113 = vmatprep.subr.bf16.mxu0 %v2195_v3 }
 0x237   :  { %2032 = vmatpush3.bf16.msra.mxu1 %v2182_v24 }
 0x238   :  { %2064 = vmatprep.subr.mxu1 %v2194_v57 }
 0x2fd   :  { %v1052_v26 = vpop.f32.mrb[8].mxu1 }
 0x2fe   :  { %v1133_v27 = vrot.slane %v1052_v26, %v2576_v25  ;;  %v2019_v28 = vpop.f32.mrb[9].mxu1 }
 0x300   :  { %v1134_v31 = vmul.f32 %v1133_v27, %v1129_v29 }
 0x301   :  { %v1125_v30 = vpop.f32.mrb[8].mxu0 }
 0x302   :  { %v1138_v32 = vrot.slane %v1125_v30, %v2576_v25  ;;  %v2024_v33 = vpop.f32.mrb[9].mxu0 }
 0x304   :  { %v1139_v34 = vadd.f32 %v1138_v32, %v1134_v31  ;;  %v2185_v31 = vld [vmem:[%s2721_s4] sm:$0xff]  }
 0x306   :  { %v1140_v35 = vmax.f32 %v1139_v34, 0.0 }
 0x308   :  { %v1141_v36 = vpack.c.bf16 %v1140_v35, %v1140_v35 }
 0x30a   :  { %2034 = vmatmul.mubr.msk.bf16.vlgmr.msra.gmra.mrb[12].mxu1 %vm563_vm14, %v1141_v36 }
 0x30b   :  { %2066 = vmatprep.mubr.msk.f32.mxu1 %vm2197_vm13, %v2194_v57 }
 0x3dd   :  { %v2629_v2 = vpop.f32.mrb[12].mxu1 }
 0x3de   :  { %v1218_v4 = vsel %vm1217_vm8, %v2629_v2, 0.0  ;;  %v1225_v44 = vmul.f32 %v2629_v2, %v2629_v2  ;;  %v2035_v45 = vpop.f32.mrb[13].mxu1 }
 0x3df   :  { %v1219_v46 = vrot.slane %v1218_v4, 4  ;;  %v1214_v47 = vpop.f32.mrb[14].mxu1 }
 0x3e0   :  { %v1226_v48 = vsel %vm1217_vm8, %v1225_v44, 0.0  ;;  %v2036_v49 = vpop.f32.mrb[15].mxu1 }
 0x3e1   :  { %v1220_v50 = vadd.f32 %v1219_v46, %v1218_v4  ;;  %v1227_v51 = vrot.slane %v1226_v48, 4 }
 0x3e3   :  { %v1221_v52 = vrot.slane %v1220_v50, 2  ;;  %v1228_v53 = vadd.f32 %v1227_v51, %v1226_v48 }
 0x3e5   :  { %v1222_v54 = vadd.f32 %v1221_v52, %v1220_v50  ;;  %v1229_v55 = vrot.slane %v1228_v53, 2 }
 0x3e7   :  { %v1223_v56 = vrot.slane %v1222_v54, 1  ;;  %v1230_v62 = vadd.f32 %v1229_v55, %v1228_v53  ;;  %v815_v53 = vld [vmem:[%s2719_s5 + $0x4] sm:$0x1] }
 0x3e9   :  { %v1224_v58 = vadd.f32 %v1223_v56, %v1222_v54  ;;  %v1231_v63 = vrot.slane %v1230_v62, 1  ;;  %v816_v56 = vld [vmem:[%s2719_s5 + $0x5] sm:$0x1] }
 0x3eb   :  { %2046 = vmatmul.mubr.msk.f32.vlgmr.msra.gmra.mrb[10].mxu0 %vm1217_vm8, %v1224_v58  ;;  %v1232_v0 = vadd.f32 %v1231_v63, %v1230_v62 }
 0x3ec   :  { %2115 = vmatpush3.bf16.msk.msra.mxu0 %vm2108_vm4, %v2196_v5  ;;  %2056 = vmatprep.mubr.msk.f32.mxu0 %vm2197_vm13, %v2194_v57 }
 0x3ed   :  { %2116 = vmatprep.subr.bf16.mxu0 %v2195_v3  ;;  %v2198_v3 = vmov 1.0  }
 0x3ee   :  { %2065 = vmatpush3.msk.msra.mxu1 %vm748_vm9, %v2198_v3 }
 0x3ef   :  { %2077 = vmatprep.subr.bf16.mxu1 %v2194_v57 }
 0x3f0   :  { %2118 = vmatpush3.bf16.msk.msra.mxu0 %vm2111_vm7, %v2196_v5 }
 0x3f1   :  { %2059 = vmatprep.subr.mxu0 %v2194_v57 }
 0x3f3   :  { %2057 = vmatmul.mubr.msk.f32.vlgmr.msra.gmra.mrb[12].mxu0 %vm1217_vm8, %v1232_v0 }
 0x3f4   :  { %2061 = vmatprep.mubr.msk.f32.mxu0 %vm2197_vm13, %v2194_v57  ;;  %2060 = vmatpush3.msk.msra.mxu0 %vm748_vm9, %v2198_v3 }
 0x3f5   :  { %2069 = vmatprep.subr.bf16.mxu0 %v2194_v57 }
 0x4be   :  { %v1302_v5 = vpop.f32.mrb[10].mxu0 }
 0x4bf   :  { %v2047_v6 = vpop.f32.mrb[11].mxu0  ;;  %v1380_v7 = vmul.f32 0.03125, %v1302_v5 }
 0x4c1   :  { %v1382_v9 = vmul.f32 %v1380_v7, %v1380_v7 }
 0x4c6   :  { %v1375_v8 = vpop.f32.mrb[12].mxu0 }
 0x4c7   :  { %v1381_v10 = vmul.f32 0.03125, %v1375_v8  ;;  %v2058_v11 = vpop.f32.mrb[13].mxu0 }
 0x4c9   :  { %v1383_v12 = vsub.f32 %v1381_v10, %v1382_v9 }
 0x4cb   :  { %v1384_v13 = vadd.f32 1e-05, %v1383_v12 }
 0x4cd   :  { %2188 = vrsqrt.f32 %v1384_v13 }
 0x4d7   :  { %v2189_v61 = vpop.eup %2188 }
 0x4d8   :  { %v1386_v14 = vmul.f32 %v2189_v61, %v813_v59 }
 0x4da   :  { %2062 = vmatmul.mubr.msk.f32.vlgmr.msra.gmra.mrb[14].mxu0 %vm1389_vm10, %v1386_v14  ;;  %v1387_v16 = vmul.f32 %v1386_v14, %v1380_v7 }
 0x4db   :  { %2073 = vmatprep.mubr.msk.bf16.mxu0 %vm2197_vm13, %v2194_v57  ;;  %2070 = vmatpush3.bf16.msra.mxu0 %v2183_v18 }
 0x4dc   :  { %v1388_v17 = vsub.f32 %v814_v15, %v1387_v16  ;;  %2071 = vmatprep.subr.bf16.mxu0 %v2194_v57 }
 0x4de   :  { %2067 = vmatmul.mubr.msk.f32.vlgmr.msra.gmra.mrb[10].mxu1 %vm1389_vm10, %v1388_v17 }
 0x4df   :  { %2079 = vmatprep.mubr.msk.bf16.mxu1 %vm2197_vm13, %v2194_v57  ;;  %2072 = vmatpush3.bf16.msra.mxu0 %v2184_v19 }
 0x4e0   :  { %2078 = vmatpush3.bf16.msra.mxu1 %v2185_v31 }
 0x5ad   :  { %v1459_v20 = vpop.f32.mrb[14].mxu0 }
 0x5ae   :  { %v1539_v21 = vrot.slane %v1459_v20, %v2576_v25  ;;  %v2063_v22 = vpop.f32.mrb[15].mxu0 }
 0x5b0   :  { %v1540_v23 = vmul.f32 %v1539_v21, %v2629_v2 }
 0x5b1   :  { %v1532_v24 = vpop.f32.mrb[10].mxu1 }
 0x5b2   :  { %v1544_v26 = vrot.slane %v1532_v24, %v2576_v25  ;;  %v2068_v27 = vpop.f32.mrb[11].mxu1 }
 0x5b4   :  { %v1545_v28 = vadd.f32 %v1544_v26, %v1540_v23 }
 0x5b6   :  { %v1546_v29 = vmax.f32 %v1545_v28, 0.0 }
 0x5b8   :  { %v1547_v30 = vpack.c.bf16 %v1546_v29, %v1546_v29 }
 0x5ba   :  { %2074 = vmatmul.mubr.msk.bf16.vlgmr.msra.gmra.mrb[16].mxu0 %vm1217_vm8, %v1547_v30  ;;  %v817_v30 = vld [vmem:[%s2719_s5 + $0x6] sm:$0x1] }
 0x68d   :  { %v1601_v32 = vpop.f32.mrb[16].mxu0 }
 0x68e   :  { %v1608_v33 = vsel %vm1607_vm11, %v1601_v32, 0.0  ;;  %v1615_v34 = vmul.f32 %v1601_v32, %v1601_v32  ;;  %v2075_v35 = vpop.f32.mrb[17].mxu0 }
 0x68f   :  { %v1609_v36 = vrot.slane %v1608_v33, 4  ;;  %v1604_v37 = vpop.f32.mrb[18].mxu0 }
 0x690   :  { %v1616_v38 = vsel %vm1607_vm11, %v1615_v34, 0.0  ;;  %v2076_v39 = vpop.f32.mrb[19].mxu0 }
 0x691   :  { %v1610_v40 = vadd.f32 %v1609_v36, %v1608_v33  ;;  %v1617_v60 = vrot.slane %v1616_v38, 4  ;;  %v818_v33 = vld [vmem:[%s2719_s5 + $0x7] sm:$0x1] }
 0x693   :  { %v1611_v41 = vrot.slane %v1610_v40, 2  ;;  %v1618_v42 = vadd.f32 %v1617_v60, %v1616_v38 }
 0x695   :  { %v1612_v43 = vadd.f32 %v1611_v41, %v1610_v40  ;;  %v1619_v2 = vrot.slane %v1618_v42, 2  ;;  %v1864_v40 = vld [vmem:[%s2719_s5 + $0x8] ss:$0 sm:$0xff] }
 0x697   :  { %v1613_v4 = vrot.slane %v1612_v43, 1  ;;  %v1620_v44 = vadd.f32 %v1619_v2, %v1618_v42 }
 0x699   :  { %v1614_v45 = vadd.f32 %v1613_v4, %v1612_v43  ;;  %v1621_v46 = vrot.slane %v1620_v44, 1 }
 0x69b   :  { %v1622_v47 = vadd.f32 %v1621_v46, %v1620_v44  ;;  %v1624_v48 = vmul.f32 0.125, %v1614_v45 }
 0x69d   :  { %v1625_v49 = vmul.f32 0.125, %v1622_v47  ;;  %v1626_v50 = vmul.f32 %v1624_v48, %v1624_v48 }
 0x69f   :  { %v1627_v51 = vsub.f32 %v1625_v49, %v1626_v50 }
 0x6a1   :  { %v1628_v52 = vadd.f32 1e-05, %v1627_v51 }
 0x6a3   :  { %2190 = vrsqrt.f32 %v1628_v52 }
 0x6ad   :  { %v2191_v54 = vpop.eup %2190 }
 0x6ae   :  { %v1630_v55 = vmul.f32 %v2191_v54, %v815_v53 }
 0x6b0   :  { %v1631_v58 = vmul.f32 %v1630_v55, %v1624_v48  ;;  %v1636_v62 = vrot.slane %v1630_v55, %v2576_v25 }
 0x6b2   :  { %v1632_v63 = vsub.f32 %v816_v56, %v1631_v58  ;;  %v1637_v0 = vmul.f32 %v1636_v62, %v1601_v32 }
 0x6b4   :  { %v1641_v1 = vrot.slane %v1632_v63, %v2576_v25 }
 0x6b6   :  { %v1642_v3 = vadd.f32 %v1641_v1, %v1637_v0 }
 0x6b8   :  { %v1643_v5 = vmax.f32 %v1642_v3, 0.0 }
 0x6ba   :  { %v1644_v6 = vpack.c.bf16 %v1643_v5, %v1643_v5 }
 0x6bc   :  { %2080 = vmatmul.mubr.msk.bf16.vlgmr.msra.gmra.mrb[16].mxu1 %vm1607_vm11, %v1644_v6 }
 0x78f   :  { %v1690_v7 = vpop.f32.mrb[16].mxu1 }
 0x790   :  { %v1696_v8 = vsel %vm978_vm1, %v1690_v7, 0.0  ;;  %v1703_v9 = vmul.f32 %v1690_v7, %v1690_v7  ;;  %v2081_v10 = vpop.f32.mrb[17].mxu1 }
 0x791   :  { %v1697_v11 = vrot.slane %v1696_v8, 4  ;;  %v1693_v12 = vpop.f32.mrb[18].mxu1 }
 0x792   :  { %v1704_v13 = vsel %vm978_vm1, %v1703_v9, 0.0  ;;  %v2082_v59 = vpop.f32.mrb[19].mxu1 }
 0x793   :  { %v1698_v61 = vadd.f32 %v1697_v11, %v1696_v8  ;;  %v1705_v14 = vrot.slane %v1704_v13, 4 }
 0x795   :  { %v1699_v15 = vrot.slane %v1698_v61, 2  ;;  %v1706_v16 = vadd.f32 %v1705_v14, %v1704_v13 }
 0x797   :  { %v1700_v17 = vadd.f32 %v1699_v15, %v1698_v61  ;;  %v1707_v18 = vrot.slane %v1706_v16, 2 }
 0x799   :  { %v1701_v19 = vrot.slane %v1700_v17, 1  ;;  %v1708_v20 = vadd.f32 %v1707_v18, %v1706_v16 }
 0x79b   :  { %v1702_v21 = vadd.f32 %v1701_v19, %v1700_v17  ;;  %v1709_v22 = vrot.slane %v1708_v20, 1 }
 0x79d   :  { %v1710_v23 = vadd.f32 %v1709_v22, %v1708_v20  ;;  %v1711_v24 = vmul.f32 0.125, %v1702_v21 }
 0x79f   :  { %v1712_v26 = vmul.f32 0.125, %v1710_v23  ;;  %v1713_v27 = vmul.f32 %v1711_v24, %v1711_v24 }
 0x7a1   :  { %v1714_v28 = vsub.f32 %v1712_v26, %v1713_v27 }
 0x7a3   :  { %v1715_v29 = vadd.f32 1e-05, %v1714_v28 }
 0x7a5   :  { %2192 = vrsqrt.f32 %v1715_v29 }
 0x7af   :  { %v2193_v31 = vpop.eup %2192 }
 0x7b0   :  { %v1717_v32 = vmul.f32 %v2193_v31, %v817_v30 }
 0x7b2   :  { %v1718_v34 = vmul.f32 %v1717_v32, %v1711_v24  ;;  %v1723_v35 = vrot.slane %v1717_v32, %v2576_v25 }
 0x7b4   :  { %v1719_v36 = vsub.f32 %v818_v33, %v1718_v34  ;;  %v1724_v37 = vmul.f32 %v1723_v35, %v1690_v7 }
 0x7b6   :  { %v1728_v38 = vrot.slane %v1719_v36, %v2576_v25 }
 0x7b8   :  { %v1729_v39 = vadd.f32 %v1728_v38, %v1724_v37 }
 0x7ba   :  { %v1730_v60 = vmax.f32 %v1729_v39, 0.0 }
 0x7bc   :  { %v1735_v41 = vmul.f32 %v1864_v40, %v1730_v60 }
 0x7be   :  { %v1736_v42 = vsel %vm978_vm1, %v1735_v41, 0.0 }
 0x7bf   :  { %1737 = vadd.xlane.f32.xlu0 %v1736_v42 }
 0x84c   :  { %v1738_v43 = vpop.xlane.xlu0 %1737 }
 0x84d   :  { %v1739_v2 = vadd.f32 %v1864_v40, %v1738_v43 }
 0x84f   :  { %1741 = vrot.lane.b32.xlu0 %v1739_v2, %s2199_s30 }
 0x8c1   :  { %v1742_v25 = vpop.permute.xlu0 %1741 }
 0x8c2   :  { %1745 = vst.msk [vmem:[%s2722_s6] sm:$0xff] %vm31_vm12, %v1742_v25 }

</bundles_post_ra>
